<compile_context>
chip_gen: v7x
topology: tpu7x:2x2x1
jax: 0.10.0
libtpu: 0.0.40
codegen_flags: <defaults>
</compile_context>

<pallas_src>
import math

import jax
import jax.numpy as jnp
from jax import lax
from jax.experimental import pallas as pl
from jax.experimental.pallas import tpu as pltpu


def _embedding_select_kernel(idx_ref, tbl_ref, out_ref):
    # idx_ref: (TILE_R, P) int8   -- P token ids packed per output row
    # tbl_ref: (V, LANE)   f32    -- embedding table, lane-tiled P times
    # out_ref: (TILE_R, LANE) f32 -- LANE = P * D
    tile_r, lane_w = out_ref.shape
    p_pack = idx_ref.shape[1]
    vocab = tbl_ref.shape[0]
    d = lane_w // p_pack

    ids = idx_ref[...].astype(jnp.int32)          # (TILE_R, P)

    # Expand per-token ids across their D-lane group: lanes [p*D, (p+1)*D)
    # take ids[:, p].  The (1, lane_w) iota keeps each lane-group mask a
    # single constant vreg; the chain is (P-1) selects of pure VPU work.
    ids_full = ids[:, 0:1]                        # (TILE_R, 1)
    if p_pack > 1:
        lane = lax.broadcasted_iota(jnp.int32, (1, lane_w), 1)
        for p in range(1, p_pack):
            ids_full = jnp.where(lane >= p * d, ids[:, p:p + 1], ids_full)

    tbl = tbl_ref[...]                            # (V, LANE), resident table
    if vocab == 4:
        # 2-level select tree: 3 compares + 3 selects per output vreg.
        # (ids are guaranteed in [0, 4) by the module.)
        lo = jnp.where(ids_full == 1, tbl[1:2, :], tbl[0:1, :])
        hi = jnp.where(ids_full == 3, tbl[3:4, :], tbl[2:3, :])
        out = jnp.where(ids_full >= 2, hi, lo)
    else:
        out = jnp.where(ids_full == 0, tbl[0:1, :], jnp.zeros((), tbl.dtype))
        for v in range(1, vocab):
            out = jnp.where(ids_full == v, tbl[v:v + 1, :], out)
    out_ref[...] = out.astype(out_ref.dtype)


def _round_up(x, m):
    return -(-x // m) * m


def embedding_lookup(indices, table):
    """indices: int array (any shape), table: (V, D) -> indices.shape + (D,)."""
    v_rows, d_model = table.shape
    idx_flat = indices.reshape(-1)
    n_tok = idx_flat.shape[0]

    # Lane packing: P = 128 / gcd(D, 128) tokens per output row so lane_w is
    # always a multiple of 128 (lane-dense output block, unmasked stores).
    p_pack = 128 // math.gcd(d_model, 128)
    lane_w = p_pack * d_model
    if p_pack > 1 and lane_w > 8192:              # guard pathological lcm blow-up
        p_pack, lane_w = 1, d_model

    rows = _round_up(max(n_tok, 1), p_pack) // p_pack

    # ~2 MiB output blocks; tile_r a multiple of 32 (int8 sublane tile) and
    # the rows split into equal-sized chunks to minimise padding waste.
    target_rows = max(32, ((1 << 21) // (lane_w * 4)) // 32 * 32)
    rows32 = _round_up(rows, 32)
    n_chunks = max(1, -(-rows32 // target_rows))
    tile_r = _round_up(-(-rows32 // n_chunks), 32)
    rows_pad = n_chunks * tile_r

    # Indices travel as int8 (values < 4): 4x less index HBM/VMEM traffic than
    # int32 under the 128-lane minor-dim padding.  Pad tokens use id 0 (their
    # rows are computed into the padded tail and sliced off below).
    idx_i8 = jnp.pad(idx_flat.astype(jnp.int8), (0, rows_pad * p_pack - n_tok))
    idx2d = idx_i8.reshape(rows_pad, p_pack)
    tbl_packed = jnp.tile(table, (1, p_pack)) if p_pack > 1 else table

    out = pl.pallas_call(
        _embedding_select_kernel,
        out_shape=jax.ShapeDtypeStruct((rows_pad, lane_w), table.dtype),
        grid=(n_chunks,),
        in_specs=[
            pl.BlockSpec((tile_r, p_pack), lambda i: (i, 0)),
            pl.BlockSpec((v_rows, lane_w), lambda i: (0, 0)),  # resident table
        ],
        out_specs=pl.BlockSpec((tile_r, lane_w), lambda i: (i, 0)),
        compiler_params=pltpu.CompilerParams(
            dimension_semantics=("parallel",),
            vmem_limit_bytes=32 * 1024 * 1024,
        ),
        cost_estimate=pl.CostEstimate(
            flops=0,
            transcendentals=0,
            bytes_accessed=int(rows_pad * 128              # lane-padded int8 idx
                               + v_rows * lane_w * 4       # resident table
                               + rows_pad * lane_w * 4),   # output writeback
        ),
    )(idx2d, tbl_packed)

    # Unpack to (..., d_model).  NOTE: this minor-dim change may trigger an XLA
    # relayout copy; consumers that can accept the packed (rows, P*D) layout
    # should take `out` directly to skip it.
    return out.reshape(rows_pad * p_pack, d_model)[:n_tok].reshape(
        *indices.shape, d_model)


class GraphEmbeddingV1:
    """JAX/Pallas port of the PyTorch GraphEmbeddingV1 module."""

    def __init__(self, h, d_model, num_different_atoms, max_in_degree,
                 max_out_degree, *, key):
        self.h = h
        self.d_model = d_model
        k0, k1, k2, k3, k4 = jax.random.split(key, 5)

        def emb(k, num, pad0):
            w = jax.random.normal(k, (num, d_model), dtype=jnp.float32)
            if pad0:
                w = w.at[0].set(0.0)  # padding_idx=0
            return w

        # Mirrors the PyTorch __init__; only tmp_embedding is used in forward.
        self.atom_type_embedding = emb(k0, num_different_atoms + 1, True)
        self.in_degree_embedding = emb(k1, max_in_degree + 1, True)
        self.out_degree_embedding = emb(k2, max_out_degree + 1, True)
        self.virtual_node_embedding = emb(k3, 1, False)
        self.tmp_embedding = emb(k4, 4, False)

    def forward(self, batch_data):
        # batch_data: (B, S) int32 with values in [0, 4)
        return embedding_lookup(batch_data, self.tmp_embedding)


if __name__ == "__main__":
    key = jax.random.PRNGKey(0)
    k_param, k_idx = jax.random.split(key)

    # Small, module-consistent shapes.
    B, S, D = 2, 8, 32
    module = GraphEmbeddingV1(
        h=4, d_model=D, num_different_atoms=10, max_in_degree=5,
        max_out_degree=5, key=k_param,
    )

    batch_data = jax.random.randint(k_idx, (B, S), 0, 4, dtype=jnp.int32)

    out = module.forward(batch_data)
    out = jax.block_until_ready(out)

    # Reference: plain gather (what nn.Embedding does).
    ref = jnp.take(module.tmp_embedding, batch_data, axis=0)
    assert out.shape == (B, S, D)
    assert jnp.allclose(out, ref, atol=1e-6), "mismatch vs reference gather"

    print("KERNEL_OK")
</pallas_src>

<mosaic_0001>
module attributes {stable_mosaic.version = 11 : i64} {
  func.func @_embedding_select_kernel(%arg0: i32, %arg1: memref<32x4xi8, #tpu.memory_space<vmem>>, %arg2: memref<4x128xf32, #tpu.memory_space<vmem>>, %arg3: memref<32x128xf32, #tpu.memory_space<vmem>>) attributes {dimension_semantics = [#tpu.dimension_semantics<parallel>], iteration_bounds = array<i64: 1>, scalar_prefetch = 0 : i64, scratch_operands = 0 : i64, tpu.core_type = #tpu.core_type<tc>, window_params = [{transform_indices = @transform_0, window_bounds = array<i64: 32, 4>}, {pipeline_mode = #tpu.pipeline_mode<synchronous>, transform_indices = @transform_1, window_bounds = array<i64: 4, 128>}, {transform_indices = @transform_2, window_bounds = array<i64: 32, 128>}]} {
    %c0 = arith.constant 0 : index
    %c0_0 = arith.constant 0 : index
    %0 = vector.load %arg1[%c0, %c0_0] : memref<32x4xi8, #tpu.memory_space<vmem>>, vector<32x4xi8>
    %1 = arith.extsi %0 : vector<32x4xi8> to vector<32x4xi32>
    %2 = vector.extract_strided_slice %1 {offsets = [0, 0], sizes = [32, 1], strides = [1, 1]} : vector<32x4xi32> to vector<32x1xi32>
    %3 = tpu.iota {dimensions = array<i32: 1>} : vector<1x128xi32>
    %c32_i32 = arith.constant 32 : i32
    %4 = vector.broadcast %c32_i32 : i32 to vector<1x128xi32>
    %5 = arith.cmpi sge, %3, %4 : vector<1x128xi32>
    %6 = vector.extract_strided_slice %1 {offsets = [0, 1], sizes = [32, 1], strides = [1, 1]} : vector<32x4xi32> to vector<32x1xi32>
    %7 = vector.shape_cast %5 : vector<1x128xi1> to vector<1x128xi1>
    %8 = vector.broadcast %7 : vector<1x128xi1> to vector<32x128xi1>
    %9 = vector.shape_cast %6 : vector<32x1xi32> to vector<32x1xi32>
    %10 = vector.broadcast %9 : vector<32x1xi32> to vector<32x128xi32>
    %11 = vector.shape_cast %2 : vector<32x1xi32> to vector<32x1xi32>
    %12 = vector.broadcast %11 : vector<32x1xi32> to vector<32x128xi32>
    %13 = arith.select %8, %10, %12 : vector<32x128xi1>, vector<32x128xi32>
    %c64_i32 = arith.constant 64 : i32
    %14 = vector.broadcast %c64_i32 : i32 to vector<1x128xi32>
    %15 = arith.cmpi sge, %3, %14 : vector<1x128xi32>
    %16 = vector.extract_strided_slice %1 {offsets = [0, 2], sizes = [32, 1], strides = [1, 1]} : vector<32x4xi32> to vector<32x1xi32>
    %17 = vector.shape_cast %15 : vector<1x128xi1> to vector<1x128xi1>
    %18 = vector.broadcast %17 : vector<1x128xi1> to vector<32x128xi1>
    %19 = vector.shape_cast %16 : vector<32x1xi32> to vector<32x1xi32>
    %20 = vector.broadcast %19 : vector<32x1xi32> to vector<32x128xi32>
    %21 = arith.select %18, %20, %13 : vector<32x128xi1>, vector<32x128xi32>
    %c96_i32 = arith.constant 96 : i32
    %22 = vector.broadcast %c96_i32 : i32 to vector<1x128xi32>
    %23 = arith.cmpi sge, %3, %22 : vector<1x128xi32>
    %24 = vector.extract_strided_slice %1 {offsets = [0, 3], sizes = [32, 1], strides = [1, 1]} : vector<32x4xi32> to vector<32x1xi32>
    %25 = vector.shape_cast %23 : vector<1x128xi1> to vector<1x128xi1>
    %26 = vector.broadcast %25 : vector<1x128xi1> to vector<32x128xi1>
    %27 = vector.shape_cast %24 : vector<32x1xi32> to vector<32x1xi32>
    %28 = vector.broadcast %27 : vector<32x1xi32> to vector<32x128xi32>
    %29 = arith.select %26, %28, %21 : vector<32x128xi1>, vector<32x128xi32>
    %c0_1 = arith.constant 0 : index
    %c0_2 = arith.constant 0 : index
    %30 = vector.load %arg2[%c0_1, %c0_2] : memref<4x128xf32, #tpu.memory_space<vmem>>, vector<4x128xf32>
    %c1_i32 = arith.constant 1 : i32
    %31 = vector.broadcast %c1_i32 : i32 to vector<32x128xi32>
    %32 = arith.cmpi eq, %29, %31 : vector<32x128xi32>
    %33 = vector.extract_strided_slice %30 {offsets = [1, 0], sizes = [1, 128], strides = [1, 1]} : vector<4x128xf32> to vector<1x128xf32>
    %34 = vector.extract_strided_slice %30 {offsets = [0, 0], sizes = [1, 128], strides = [1, 1]} : vector<4x128xf32> to vector<1x128xf32>
    %35 = vector.shape_cast %33 : vector<1x128xf32> to vector<1x128xf32>
    %36 = vector.broadcast %35 : vector<1x128xf32> to vector<32x128xf32>
    %37 = vector.shape_cast %34 : vector<1x128xf32> to vector<1x128xf32>
    %38 = vector.broadcast %37 : vector<1x128xf32> to vector<32x128xf32>
    %39 = arith.select %32, %36, %38 : vector<32x128xi1>, vector<32x128xf32>
    %c3_i32 = arith.constant 3 : i32
    %40 = vector.broadcast %c3_i32 : i32 to vector<32x128xi32>
    %41 = arith.cmpi eq, %29, %40 : vector<32x128xi32>
    %42 = vector.extract_strided_slice %30 {offsets = [3, 0], sizes = [1, 128], strides = [1, 1]} : vector<4x128xf32> to vector<1x128xf32>
    %43 = vector.extract_strided_slice %30 {offsets = [2, 0], sizes = [1, 128], strides = [1, 1]} : vector<4x128xf32> to vector<1x128xf32>
    %44 = vector.shape_cast %42 : vector<1x128xf32> to vector<1x128xf32>
    %45 = vector.broadcast %44 : vector<1x128xf32> to vector<32x128xf32>
    %46 = vector.shape_cast %43 : vector<1x128xf32> to vector<1x128xf32>
    %47 = vector.broadcast %46 : vector<1x128xf32> to vector<32x128xf32>
    %48 = arith.select %41, %45, %47 : vector<32x128xi1>, vector<32x128xf32>
    %c2_i32 = arith.constant 2 : i32
    %49 = vector.broadcast %c2_i32 : i32 to vector<32x128xi32>
    %50 = arith.cmpi sge, %29, %49 : vector<32x128xi32>
    %51 = arith.select %50, %48, %39 : vector<32x128xi1>, vector<32x128xf32>
    %c0_3 = arith.constant 0 : index
    %c0_4 = arith.constant 0 : index
    %52 = vector.load %arg3[%c0_3, %c0_4] : memref<32x128xf32, #tpu.memory_space<vmem>>, vector<32x128xf32>
    tpu.vector_store %arg3[%c0_3, %c0_4], %51 {strides = array<i32>} : memref<32x128xf32, #tpu.memory_space<vmem>>, vector<32x128xf32>,
    return
  }
  func.func @transform_0(%arg0: i32) -> (i32, i32) {
    %c0_i32 = arith.constant 0 : i32
    %c0_i32_0 = arith.constant 0 : i32
    return %arg0, %c0_i32 : i32, i32
  }
  func.func @transform_1(%arg0: i32) -> (i32, i32) {
    %c0_i32 = arith.constant 0 : i32
    %c0_i32_0 = arith.constant 0 : i32
    %c0_i32_1 = arith.constant 0 : i32
    return %c0_i32, %c0_i32_0 : i32, i32
  }
  func.func @transform_2(%arg0: i32) -> (i32, i32) {
    %c0_i32 = arith.constant 0 : i32
    %c0_i32_0 = arith.constant 0 : i32
    return %arg0, %c0_i32 : i32, i32
  }
}

</mosaic_0001>

<bundles_post_ra>
// kernel: tpu_custom_call.1
= control target key start
LH: loop header
LB: loop body
LE: loop exit
PB: predicated region body
PF: predicated region fallthrough
CT: control target
= control target key end

     0   :  { %v200_v1 = vmov 1   ;;  %s252_s0 = inlined_call_operand.vmem [shape: s8[32,4], index: 0, kind: input, shape index: {}]   ;;  %s253_s1 = inlined_call_operand.vmem [shape: f32[4,128], index: 1, kind: input, shape index: {}]   ;;  %s254_s2 = inlined_call_operand.hbm [shape: f32[32,128], index: 2, kind: output, shape index: {}]  }
   0x1   :  { %v160_v0 = vld [vmem:[%s252_s0] sm:$0xff]   ;;  %169 = vset.pattern.permute.xlu1 %v200_v1  ;;  %168 = vset.pattern.permute.xlu0 %v200_v1 }
   0x2   :  { %v158_v2 = vunpack.c.2.s8 %v160_v0  ;;  %v154_v3 = vunpack.c.0.s8 %v160_v0 }
   0x3   :  { %7 = vsyncpa [#allocation3], 0  ;;  %v159_v4 = vunpack.c.3.s8 %v160_v0  ;;  %v155_v5 = vunpack.c.1.s8 %v160_v0  ;;  %v201_v6 = vmov 0   ;;  %v202_v7 = vmov 2   ;;  %v91_v23 = vld [vmem:[%s253_s1] sm:$0xf] }
   0x4   :  { %32 = vperm.xlu1 %169, %v158_v2   ;;  %26 = vperm.xlu0 %168, %v154_v3   ;;  %v203_v8 = vmov 3   ;;  %v20_v15 = vlaneseq  ;;  %s204_s1 = smov [#allocation2]  }
   0x5   :  { %s141_s12 = sshll.u32 %s204_s1, 4  ;;  %s142_s12 = int_to_ptr.vmem [resolvable:$true] %s141_s12 }
   0x6   :  { %v97_v16 = vshrl.u32 %v20_v15, 7  ;;  %v21_v19 = vand.u32 127, %v20_v15  ;;  %s176_s13 = scalar_lea.vmem %s142_s12, 512  ;;  %p181_p1 = scmp.lt.s32.totalorder %s142_s12, %s142_s12 }
   0x7   :  { %p177_p0 = scmp.ne.s32.totalorder %s142_s12, %s176_s13  ;;  %p182_p2 = scmp.lt.s32.totalorder %s176_s13, %s176_s13 }
   0x8   :  { %35 = vperm.xlu1 %169, %v159_v4   ;;  %29 = vperm.xlu0 %168, %v155_v5   ;;  %v98_v20 = vsub.s32 1, %v97_v16  ;;  %v102_v24 = vsub.s32 0, %v97_v16  ;;  %v114_v25 = vsub.s32 3, %v97_v16  ;;  %v118_v26 = vsub.s32 2, %v97_v16 }
   0x9   :  { %vm22_vm0 = vcmp.ge.s32.totalorder %v21_v19, 32  ;;  %vm53_vm1 = vcmp.ge.s32.totalorder %v21_v19, 64  ;;  %vm72_vm2 = vcmp.ge.s32.totalorder %v21_v19, 96  ;;  %p183_p3 = por %p182_p2, %p181_p1 }
   0xa   :  { %v99_v27 = vrot.slane %v91_v23, %v98_v20  ;;  %v103_v30 = vrot.slane %v91_v23, %v102_v24  ;;  %v115_v31 = vrot.slane %v91_v23, %v114_v25  ;;  %v119_v32 = vrot.slane %v91_v23, %v118_v26 }
   0xb   :  { %p184_p4 = pnand %p183_p3, %p177_p0 }
   0xc   :  { %171 = vset.pattern.permute.xlu1 %v201_v6  ;;  %170 = vset.pattern.permute.xlu0 %v201_v6 }
   0xd   :  { %41 = vperm.xlu1 %171, %v155_v5   ;;  %38 = vperm.xlu0 %170, %v154_v3  }
  0x11   :  { %44 = vperm.xlu1 %171, %v158_v2   ;;  %47 = vperm.xlu0 %170, %v159_v4  }
  0x15   :  { %172 = vset.pattern.permute.xlu1 %v202_v7  ;;  %173 = vset.pattern.permute.xlu0 %v202_v7 }
  0x16   :  { %57 = vperm.xlu1 %172, %v154_v3   ;;  %60 = vperm.xlu0 %173, %v155_v5  }
  0x1a   :  { %63 = vperm.xlu1 %172, %v158_v2   ;;  %174 = vset.pattern.permute.xlu0 %v203_v8 }
  0x1b   :  { %76 = vperm.xlu0 %174, %v154_v3  }
  0x1e   :  { %66 = vperm.xlu1 %172, %v159_v4  }
  0x1f   :  { %85 = vperm.xlu0 %174, %v159_v4  }
  0x22   :  { %175 = vset.pattern.permute.xlu1 %v203_v8 }
  0x23   :  { %79 = vperm.xlu1 %175, %v155_v5  }
  0x27   :  { %82 = vperm.xlu1 %175, %v158_v2  }
  0x83   :  { %v33_v9 = vpop.permute.xlu1 %32  ;;  %v27_v10 = vpop.permute.xlu0 %26 }
  0x87   :  { %v36_v11 = vpop.permute.xlu1 %35  ;;  %v30_v12 = vpop.permute.xlu0 %29 }
  0x8c   :  { %v42_v13 = vpop.permute.xlu1 %41  ;;  %v39_v14 = vpop.permute.xlu0 %38 }
  0x8d   :  { %v49_v28 = vsel %vm22_vm0, %v27_v10, %v39_v14  ;;  %v50_v44 = vsel %vm22_vm0, %v30_v12, %v42_v13 }
  0x90   :  { %v45_v17 = vpop.permute.xlu1 %44  ;;  %v48_v18 = vpop.permute.xlu0 %47 }
  0x91   :  { %v52_v36 = vsel %vm22_vm0, %v36_v11, %v48_v18  ;;  %v51_v51 = vsel %vm22_vm0, %v33_v9, %v45_v17 }
  0x95   :  { %v58_v21 = vpop.permute.xlu1 %57  ;;  %v61_v22 = vpop.permute.xlu0 %60 }
  0x96   :  { %v68_v33 = vsel %vm53_vm1, %v58_v21, %v49_v28  ;;  %v69_v47 = vsel %vm53_vm1, %v61_v22, %v50_v44 }
  0x99   :  { %v64_v29 = vpop.permute.xlu1 %63 }
  0x9a   :  { %v77_v34 = vpop.permute.xlu0 %76  ;;  %v70_v54 = vsel %vm53_vm1, %v64_v29, %v51_v51 }
  0x9b   :  { %v87_v35 = vsel %vm72_vm2, %v77_v34, %v68_v33 }
  0x9c   :  { %vm92_vm3 = vcmp.eq.s32.totalorder %v87_v35, 1  ;;  %vm108_vm4 = vcmp.eq.s32.totalorder %v87_v35, 3  ;;  %vm124_vm5 = vcmp.ge.s32.totalorder %v87_v35, 2 }
  0x9d   :  { %v104_v37 = vsel %vm92_vm3, %v99_v27, %v103_v30  ;;  %v120_v38 = vsel %vm108_vm4, %v115_v31, %v119_v32  ;;  %v67_v39 = vpop.permute.xlu1 %66 }
  0x9e   :  { %v128_v40 = vsel %vm124_vm5, %v120_v38, %v104_v37  ;;  %v71_v41 = vsel %vm53_vm1, %v67_v39, %v52_v36  ;;  %v86_v42 = vpop.permute.xlu0 %85 }
  0x9f   :  { %132 = vst [vmem:[#allocation2] sm:$0xff] %v128_v40  ;;  %v90_v43 = vsel %vm72_vm2, %v86_v42, %v71_v41 }
  0xa0   :  { %vm95_vm6 = vcmp.eq.s32.totalorder %v90_v43, 1  ;;  %vm111_vm7 = vcmp.eq.s32.totalorder %v90_v43, 3  ;;  %vm127_vm8 = vcmp.ge.s32.totalorder %v90_v43, 2 }
  0xa1   :  { %v107_v45 = vsel %vm95_vm6, %v99_v27, %v103_v30  ;;  %v123_v46 = vsel %vm111_vm7, %v115_v31, %v119_v32 }
  0xa2   :  { %v131_v48 = vsel %vm127_vm8, %v123_v46, %v107_v45  ;;  %v80_v49 = vpop.permute.xlu1 %79 }
  0xa3   :  { %135 = vst [vmem:[#allocation2 + $0x18] sm:$0xff] %v131_v48  ;;  %v88_v50 = vsel %vm72_vm2, %v80_v49, %v69_v47 }
  0xa4   :  { %vm93_vm9 = vcmp.eq.s32.totalorder %v88_v50, 1  ;;  %vm109_vm10 = vcmp.eq.s32.totalorder %v88_v50, 3  ;;  %vm125_vm11 = vcmp.ge.s32.totalorder %v88_v50, 2 }
  0xa5   :  { %v105_v52 = vsel %vm93_vm9, %v99_v27, %v103_v30  ;;  %v121_v53 = vsel %vm109_vm10, %v115_v31, %v119_v32 }
  0xa6   :  { %v129_v55 = vsel %vm125_vm11, %v121_v53, %v105_v52  ;;  %v83_v56 = vpop.permute.xlu1 %82 }
  0xa7   :  { %133 = vst [vmem:[#allocation2 + $0x8] sm:$0xff] %v129_v55  ;;  %v89_v57 = vsel %vm72_vm2, %v83_v56, %v70_v54 }
  0xa8   :  { %vm94_vm12 = vcmp.eq.s32.totalorder %v89_v57, 1  ;;  %vm110_vm13 = vcmp.eq.s32.totalorder %v89_v57, 3  ;;  %vm126_vm14 = vcmp.ge.s32.totalorder %v89_v57, 2 }
  0xa9   :  { %v106_v58 = vsel %vm94_vm12, %v99_v27, %v103_v30  ;;  %v122_v59 = vsel %vm110_vm13, %v115_v31, %v119_v32 }
  0xaa   :  { %v130_v60 = vsel %vm126_vm14, %v122_v59, %v106_v58 }
  0xab   :  { %134 = vst [vmem:[#allocation2 + $0x10] sm:$0xff] %v130_v60 }
  0xac   :  { %187 = shalt.err (!%p184_p4)
}
  0xad   :  { %s188_s16 = scalar_lea.hbm %s254_s2, 512 }
  0xae   :  { %p189_p5 = scmp.ne.s32.totalorder %s254_s2, %s188_s16  ;;  %p192_p6 = scmp.lt.u32.totalorder %s188_s16, %s254_s2 }
  0xb0   :  { %p194_p7 = pnand %p192_p6, %p189_p5 }
  0xb2   :  { %197 = shalt.err (!%p194_p7)
}
  0xb3   :  { %s205_s21 = smov 128   ;;  %s206_s22 = smov 8  }
  0xb4   :  { %147 = dma.vmem_to_hbm [thread:$0]  %s142_s12, 512, %s254_s2, [#allocation3], %s205_s21, %s205_s21, %s206_s22  }
  0xb5   :  { %198 = dma.done.wait [#allocation3], 512  }
  0xb6   :  { %199 = vsyncadd [#allocation3], 4294966784 }
  0xb7   :  { %151 = vsyncpa [#allocation3], 1 }

</bundles_post_ra>
